<compile_context>
chip_gen: v6e
topology: v6e:2x2x1
jax: 0.10.0
libtpu: 0.0.40
codegen_flags: <defaults>
</compile_context>

<pallas_src>
import functools

import jax
import jax.numpy as jnp
from jax import lax
from jax.experimental import pallas as pl
from jax.experimental.pallas import tpu as pltpu

_X_EPS = 1e-5  # matches torch: x.div(x_norm + 1e-05)


def _round_up(n, m):
    return ((n + m - 1) // m) * m


# ------------------------------ Pallas kernel -------------------------------

def _euclid_linear_kernel(x_ref, v_ref, g_ref, o_ref, *, scale):
    """Fused: row L2-normalize(x) -> weight-norm(W) -> matmul -> scale."""
    x = x_ref[...]                                            # (TB, Kp) f32
    # Row-wise normalization: x / (||x||_2 + 1e-5).  Zero-padded K columns
    # and zero-padded rows contribute nothing / stay zero.
    row_ss = jnp.sum(x * x, axis=1, keepdims=True)            # (TB, 1)
    xn = x * (1.0 / (jnp.sqrt(row_ss) + _X_EPS))

    # WeightNorm reparametrization (dim=0): column j of v_ref holds weight
    # row j of nn.Linear; W[:, j] = g[j] * v[:, j] / ||v[:, j]||_2.
    v = v_ref[...]                                            # (Kp, Np)
    col_ss = jnp.sum(v * v, axis=0, keepdims=True)            # (1, Np)
    inv_wnorm = jnp.where(col_ss > 0.0, lax.rsqrt(col_ss), 0.0)
    w = v * (g_ref[...] * inv_wnorm)                          # (Kp, Np)

    # Cosine scores, scaled (MXU matmul, f32 accumulation).
    o_ref[...] = scale * jnp.dot(xn, w, preferred_element_type=jnp.float32)


# --------------------------------- wrapper ----------------------------------

def euclidean_dist_linear_forward(x, v, g):
    """Pallas forward of EuclideanDistLinear.

    x: (B, indim) inputs
    v: (outdim, indim) WeightNorm 'weight_v' parameter of nn.Linear
    g: (outdim,)      WeightNorm 'weight_g' parameter
    returns (B, outdim) scores.
    """
    B, indim = x.shape
    outdim = v.shape[0]
    scale = 2.0 if outdim <= 200 else 10.0   # static (shape-dependent)

    # Pad to TPU-friendly shapes: lane dims -> multiple of 128, rows -> x8.
    kp = _round_up(indim, 128)
    np_ = _round_up(outdim, 128)
    tb = min(256, _round_up(B, 8))           # row tile (multiple of 8)
    bp = _round_up(B, tb)

    xf = x.astype(jnp.float32)
    xp = jnp.zeros((bp, kp), jnp.float32).at[:B, :indim].set(xf)
    # v transposed so the contraction dim is the sublane axis, outputs on lanes.
    vtp = jnp.zeros((kp, np_), jnp.float32).at[:indim, :outdim].set(
        v.astype(jnp.float32).T)
    gp = jnp.zeros((1, np_), jnp.float32).at[0, :outdim].set(
        g.astype(jnp.float32))

    out = pl.pallas_call(
        functools.partial(_euclid_linear_kernel, scale=scale),
        out_shape=jax.ShapeDtypeStruct((bp, np_), jnp.float32),
        grid=(bp // tb,),
        in_specs=[
            pl.BlockSpec((tb, kp), lambda i: (i, 0)),   # x row tile
            pl.BlockSpec((kp, np_), lambda i: (0, 0)),  # weight (resident)
            pl.BlockSpec((1, np_), lambda i: (0, 0)),   # g (resident)
        ],
        out_specs=pl.BlockSpec((tb, np_), lambda i: (i, 0)),
        compiler_params=pltpu.CompilerParams(
            dimension_semantics=("parallel",)),
    )(xp, vtp, gp)

    return out[:B, :outdim].astype(x.dtype)


# --------------------------- pure-JAX reference ------------------------------

def _reference_forward(x, v, g):
    outdim = v.shape[0]
    scale = 2.0 if outdim <= 200 else 10.0
    w = g[:, None] * v / jnp.linalg.norm(v, axis=1, keepdims=True)
    xn = x / (jnp.linalg.norm(x, axis=1, keepdims=True) + _X_EPS)
    return scale * (xn @ w.T)


# ----------------------------------- main ------------------------------------

if __name__ == "__main__":
    # Small shapes consistent with a few-shot classifier head:
    # batch=8, indim (feature dim)=64, outdim (classes)=5  -> scale_factor=2.
    B, INDIM, OUTDIM = 8, 64, 5

    key = jax.random.PRNGKey(0)
    kx, kv, kg = jax.random.split(key, 3)

    x = jax.random.normal(kx, (B, INDIM), jnp.float32)
    v = 0.1 * jax.random.normal(kv, (OUTDIM, INDIM), jnp.float32)
    # WeightNorm initializes g to the per-row norm of v; perturb it so the
    # g-scaling path is actually exercised.
    g = (jnp.linalg.norm(v, axis=1)
         * (1.0 + 0.1 * jax.random.normal(kg, (OUTDIM,), jnp.float32)))

    out = jax.jit(euclidean_dist_linear_forward)(x, v, g)
    out = jax.block_until_ready(out)
    assert out.shape == (B, OUTDIM), out.shape

    ref = _reference_forward(x, v, g)
    assert jnp.allclose(out, ref, atol=1e-4, rtol=1e-4), (
        float(jnp.max(jnp.abs(out - ref))))

    print("KERNEL_OK")
</pallas_src>

<mosaic_0001>
module attributes {stable_mosaic.version = 11 : i64} {
  func.func @_euclid_linear_kernel(%arg0: i32, %arg1: memref<8x128xf32, #tpu.memory_space<vmem>>, %arg2: memref<128x128xf32, #tpu.memory_space<vmem>>, %arg3: memref<1x128xf32, #tpu.memory_space<vmem>>, %arg4: memref<8x128xf32, #tpu.memory_space<vmem>>) attributes {dimension_semantics = [#tpu.dimension_semantics<parallel>], iteration_bounds = array<i64: 1>, scalar_prefetch = 0 : i64, scratch_operands = 0 : i64, tpu.core_type = #tpu.core_type<tc>, window_params = [{transform_indices = @transform_0, window_bounds = array<i64: 8, 128>}, {pipeline_mode = #tpu.pipeline_mode<synchronous>, transform_indices = @transform_1, window_bounds = array<i64: 128, 128>}, {pipeline_mode = #tpu.pipeline_mode<synchronous>, transform_indices = @transform_2, window_bounds = array<i64: 1, 128>}, {transform_indices = @transform_3, window_bounds = array<i64: 8, 128>}]} {
    %c0 = arith.constant 0 : index
    %c0_0 = arith.constant 0 : index
    %0 = vector.load %arg1[%c0, %c0_0] : memref<8x128xf32, #tpu.memory_space<vmem>>, vector<8x128xf32>
    %1 = arith.mulf %0, %0 : vector<8x128xf32>
    %cst = arith.constant dense<0.000000e+00> : vector<8xf32>
    %2 = vector.multi_reduction <add>, %1, %cst [1] : vector<8x128xf32> to vector<8xf32>
    %3 = vector.shape_cast %2 : vector<8xf32> to vector<8x1xf32>
    %4 = math.sqrt %3 : vector<8x1xf32>
    %cst_1 = arith.constant 9.99999974E-6 : f32
    %5 = vector.broadcast %cst_1 : f32 to vector<8x1xf32>
    %6 = arith.addf %4, %5 : vector<8x1xf32>
    %cst_2 = arith.constant 1.000000e+00 : f32
    %7 = vector.broadcast %cst_2 : f32 to vector<8x1xf32>
    %8 = arith.divf %7, %6 : vector<8x1xf32>
    %9 = vector.broadcast %8 : vector<8x1xf32> to vector<8x128xf32>
    %10 = arith.mulf %0, %9 : vector<8x128xf32>
    %c0_3 = arith.constant 0 : index
    %c0_4 = arith.constant 0 : index
    %11 = vector.load %arg2[%c0_3, %c0_4] : memref<128x128xf32, #tpu.memory_space<vmem>>, vector<128x128xf32>
    %12 = arith.mulf %11, %11 : vector<128x128xf32>
    %cst_5 = arith.constant dense<0.000000e+00> : vector<128xf32>
    %13 = vector.multi_reduction <add>, %12, %cst_5 [0] : vector<128x128xf32> to vector<128xf32>
    %14 = vector.shape_cast %13 : vector<128xf32> to vector<1x128xf32>
    %cst_6 = arith.constant 0.000000e+00 : f32
    %15 = vector.broadcast %cst_6 : f32 to vector<1x128xf32>
    %16 = arith.cmpf ogt, %14, %15 : vector<1x128xf32>
    %17 = math.rsqrt %14 : vector<1x128xf32>
    %cst_7 = arith.constant 0.000000e+00 : f32
    %18 = vector.broadcast %cst_7 : f32 to vector<1x128xf32>
    %19 = arith.select %16, %17, %18 : vector<1x128xi1>, vector<1x128xf32>
    %c0_8 = arith.constant 0 : index
    %c0_9 = arith.constant 0 : index
    %20 = vector.load %arg3[%c0_8, %c0_9] : memref<1x128xf32, #tpu.memory_space<vmem>>, vector<1x128xf32>
    %21 = arith.mulf %20, %19 : vector<1x128xf32>
    %22 = vector.broadcast %21 : vector<1x128xf32> to vector<128x128xf32>
    %23 = arith.mulf %11, %22 : vector<128x128xf32>
    %cst_10 = arith.constant dense<0.000000e+00> : vector<8x128xf32>
    %24 = tpu.matmul %10, %23, %cst_10 {dimension_numbers = #tpu.dot_dimension_numbers<[1], [0], [0], [1], [0, 0, 1, 1], [], []>} : vector<8x128xf32>, vector<128x128xf32>, vector<8x128xf32> -> vector<8x128xf32>
    %cst_11 = arith.constant 2.000000e+00 : f32
    %25 = vector.broadcast %cst_11 : f32 to vector<8x128xf32>
    %26 = arith.mulf %25, %24 : vector<8x128xf32>
    %c0_12 = arith.constant 0 : index
    %c0_13 = arith.constant 0 : index
    %27 = vector.load %arg4[%c0_12, %c0_13] : memref<8x128xf32, #tpu.memory_space<vmem>>, vector<8x128xf32>
    tpu.vector_store %arg4[%c0_12, %c0_13], %26 {strides = array<i32>} : memref<8x128xf32, #tpu.memory_space<vmem>>, vector<8x128xf32>,
    return
  }
  func.func @transform_0(%arg0: i32) -> (i32, i32) {
    %c0_i32 = arith.constant 0 : i32
    %c0_i32_0 = arith.constant 0 : i32
    return %arg0, %c0_i32 : i32, i32
  }
  func.func @transform_1(%arg0: i32) -> (i32, i32) {
    %c0_i32 = arith.constant 0 : i32
    %c0_i32_0 = arith.constant 0 : i32
    %c0_i32_1 = arith.constant 0 : i32
    return %c0_i32, %c0_i32_0 : i32, i32
  }
  func.func @transform_2(%arg0: i32) -> (i32, i32) {
    %c0_i32 = arith.constant 0 : i32
    %c0_i32_0 = arith.constant 0 : i32
    %c0_i32_1 = arith.constant 0 : i32
    return %c0_i32, %c0_i32_0 : i32, i32
  }
  func.func @transform_3(%arg0: i32) -> (i32, i32) {
    %c0_i32 = arith.constant 0 : i32
    %c0_i32_0 = arith.constant 0 : i32
    return %arg0, %c0_i32 : i32, i32
  }
}

</mosaic_0001>

<bundles_post_ra>
// kernel: euclidean_dist_linear_forward.1
= control target key start
LH: loop header
LB: loop body
LE: loop exit
PB: predicated region body
PF: predicated region fallthrough
CT: control target
= control target key end

     0   :  { %s426_s0 = inlined_call_operand.vmem [shape: f32[8,128], index: 0, kind: input, shape index: {}]   ;;  %s427_s1 = inlined_call_operand.vmem [shape: f32[128,128], index: 1, kind: input, shape index: {}]   ;;  %s428_s2 = inlined_call_operand.vmem [shape: f32[1,128], index: 2, kind: input, shape index: {}]   ;;  %s429_s3 = inlined_call_operand.hbm [shape: f32[8,128], index: 3, kind: output, shape index: {}]  }
   0x1   :  { %v305_v0 = vld [vmem:[%s426_s0] sm:$0xff]  ;;  %v315_v2 = vld [vmem:[%s427_s1 + $0x8] sm:$0xff]  ;;  %v322_v4 = vld [vmem:[%s427_s1 + $0x10] sm:$0xff] }
   0x2   :  { %v310_v1 = vld [vmem:[%s427_s1] sm:$0xff]  ;;  %v16_v3 = vmul.f32 %v305_v0, %v305_v0  ;;  %v327_v5 = vld [vmem:[%s427_s1 + $0x18] sm:$0xff]  ;;  %v47_v7 = vmul.f32 %v315_v2, %v315_v2  ;;  %v48_v9 = vmul.f32 %v322_v4, %v322_v4  ;;  %v345_v12 = vld [vmem:[%s427_s1 + $0x28] sm:$0xff] }
   0x3   :  { %v46_v6 = vmul.f32 %v310_v1, %v310_v1  ;;  %v336_v8 = vld [vmem:[%s427_s1 + $0x20] sm:$0xff]  ;;  %v49_v10 = vmul.f32 %v327_v5, %v327_v5 }
   0x4   :  { %17 = vadd.xlane.f32.xlu0 %v16_v3  ;;  %v50_v13 = vmul.f32 %v336_v8, %v336_v8 }
   0x5   :  { %v62_v11 = vadd.f32 %v47_v7, %v46_v6 }
   0x7   :  { %v63_v14 = vadd.f32 %v62_v11, %v48_v9 }
   0x8   :  { %8 = vsyncpa [#allocation3], 0  ;;  %v352_v15 = vld [vmem:[%s427_s1 + $0x30] sm:$0xff]  ;;  %v51_v16 = vmul.f32 %v345_v12, %v345_v12  ;;  %v359_v18 = vld [vmem:[%s427_s1 + $0x38] sm:$0xff]  ;;  %v279_v31 = vmov 0.0   ;;  %vm280_vm0 = vmmov 0   ;;  %v89_v56 = vlaneseq }
   0x9   :  { %v64_v17 = vadd.f32 %v63_v14, %v49_v10  ;;  %v52_v19 = vmul.f32 %v352_v15, %v352_v15  ;;  %v366_v21 = vld [vmem:[%s427_s1 + $0x40] sm:$0xff]  ;;  %v53_v22 = vmul.f32 %v359_v18, %v359_v18  ;;  %v39_v24 = vld [vmem:[%s427_s1 + $0x48] sm:$0xff]  ;;  %v40_v27 = vld [vmem:[%s427_s1 + $0x50] sm:$0xff]  ;;  %213 = vmatprep.subr.mxu0 %v279_v31  ;;  %245 = vmatprep.mubr.msk.f32.mxu0 %vm280_vm0, %v279_v31 }
   0xa   :  { %v54_v25 = vmul.f32 %v366_v21, %v366_v21  ;;  %v55_v28 = vmul.f32 %v39_v24, %v39_v24  ;;  %v41_v30 = vld [vmem:[%s427_s1 + $0x58] sm:$0xff]  ;;  %v56_v32 = vmul.f32 %v40_v27, %v40_v27  ;;  %v42_v34 = vld [vmem:[%s427_s1 + $0x60] sm:$0xff]  ;;  %v43_v37 = vld [vmem:[%s427_s1 + $0x68] sm:$0xff]  ;;  %v90_v57 = vshrl.u32 %v89_v56, 7 }
   0xb   :  { %v65_v20 = vadd.f32 %v64_v17, %v50_v13  ;;  %v57_v35 = vmul.f32 %v41_v30, %v41_v30  ;;  %v58_v38 = vmul.f32 %v42_v34, %v42_v34  ;;  %v44_v40 = vld [vmem:[%s427_s1 + $0x70] sm:$0xff]  ;;  %v59_v41 = vmul.f32 %v43_v37, %v43_v37  ;;  %v45_v43 = vld [vmem:[%s427_s1 + $0x78] sm:$0xff]  ;;  %v86_v58 = vld [vmem:[%s428_s2] sm:$0x1]  ;;  %s281_s2 = smov [#allocation2]  }
   0xc   :  { %v60_v44 = vmul.f32 %v44_v40, %v44_v40  ;;  %v61_v46 = vmul.f32 %v45_v43, %v45_v43  ;;  %v91_v60 = vsub.s32 0, %v90_v57  ;;  %s188_s19 = sshll.u32 %s281_s2, 4  ;;  %s189_s19 = int_to_ptr.vmem [resolvable:$true] %s188_s19 }
   0xd   :  { %v66_v23 = vadd.f32 %v65_v20, %v51_v16  ;;  %s257_s0 = scalar_lea.vmem %s189_s19, 128  ;;  %p262_p1 = scmp.lt.s32.totalorder %s189_s19, %s189_s19 }
   0xe   :  { %p258_p0 = scmp.ne.s32.totalorder %s189_s19, %s257_s0  ;;  %p263_p2 = scmp.lt.s32.totalorder %s257_s0, %s257_s0 }
   0xf   :  { %v67_v26 = vadd.f32 %v66_v23, %v52_v19 }
  0x10   :  { %p264_p3 = por %p263_p2, %p262_p1 }
  0x11   :  { %v68_v29 = vadd.f32 %v67_v26, %v53_v22 }
  0x12   :  { %p265_p4 = pnand %p264_p3, %p258_p0 }
  0x13   :  { %v69_v33 = vadd.f32 %v68_v29, %v54_v25 }
  0x15   :  { %v70_v36 = vadd.f32 %v69_v33, %v55_v28 }
  0x17   :  { %v71_v39 = vadd.f32 %v70_v36, %v56_v32 }
  0x19   :  { %v72_v42 = vadd.f32 %v71_v39, %v57_v35 }
  0x1b   :  { %v73_v45 = vadd.f32 %v72_v42, %v58_v38 }
  0x1d   :  { %v74_v47 = vadd.f32 %v73_v45, %v59_v41 }
  0x1f   :  { %v75_v48 = vadd.f32 %v74_v47, %v60_v44 }
  0x21   :  { %v76_v49 = vadd.f32 %v75_v48, %v61_v46 }
  0x23   :  { %v77_v50 = vrot.slane %v76_v49, 4 }
  0x25   :  { %v78_v51 = vadd.f32 %v77_v50, %v76_v49 }
  0x27   :  { %v79_v52 = vrot.slane %v78_v51, 2 }
  0x29   :  { %v80_v53 = vadd.f32 %v79_v52, %v78_v51 }
  0x2b   :  { %v81_v54 = vrot.slane %v80_v53, 1 }
  0x2d   :  { %v82_v55 = vadd.f32 %v81_v54, %v80_v53 }
  0x2f   :  { %251 = vrsqrt.f32 %v82_v55  ;;  %vm83_vm1 = vcmp.gt.f32.partialorder %v82_v55, 0.0 }
  0x3c   :  { %v252_v59 = vpop.eup %251 }
  0x3d   :  { %v85_v61 = vsel %vm83_vm1, %v252_v59, 0.0 }
  0x3e   :  { %v87_v62 = vmul.f32 %v86_v58, %v85_v61 }
  0x40   :  { %v92_v63 = vrot.slane %v87_v62, %v91_v60 }
  0x42   :  { %v109_v3 = vmul.f32 %v92_v63, %v45_v43  ;;  %v108_v6 = vmul.f32 %v92_v63, %v44_v40  ;;  %v107_v7 = vmul.f32 %v92_v63, %v43_v37  ;;  %v106_v9 = vmul.f32 %v92_v63, %v42_v34 }
  0x43   :  { %v105_v10 = vmul.f32 %v92_v63, %v41_v30  ;;  %v104_v11 = vmul.f32 %v92_v63, %v40_v27  ;;  %v103_v13 = vmul.f32 %v92_v63, %v39_v24  ;;  %v102_v14 = vmul.f32 %v92_v63, %v366_v21 }
  0x44   :  { %214 = vmatpush3.msra.mxu0 %v109_v3  ;;  %v101_v16 = vmul.f32 %v92_v63, %v359_v18  ;;  %v100_v17 = vmul.f32 %v92_v63, %v352_v15  ;;  %v99_v19 = vmul.f32 %v92_v63, %v345_v12  ;;  %v98_v20 = vmul.f32 %v92_v63, %v336_v8 }
  0x45   :  { %215 = vmatprep.subr.mxu0 %v279_v31  ;;  %v97_v18 = vmul.f32 %v92_v63, %v327_v5  ;;  %v96_v15 = vmul.f32 %v92_v63, %v322_v4  ;;  %v95_v12 = vmul.f32 %v92_v63, %v315_v2  ;;  %v94_v8 = vmul.f32 %v92_v63, %v310_v1 }
  0x46   :  { %216 = vmatpush3.msra.mxu0 %v108_v6 }
  0x47   :  { %217 = vmatprep.subr.mxu0 %v279_v31 }
  0x48   :  { %218 = vmatpush3.msra.mxu0 %v107_v7 }
  0x49   :  { %219 = vmatprep.subr.mxu0 %v279_v31 }
  0x4a   :  { %220 = vmatpush3.msra.mxu0 %v106_v9 }
  0x4b   :  { %221 = vmatprep.subr.mxu0 %v279_v31 }
  0x4c   :  { %222 = vmatpush3.msra.mxu0 %v105_v10 }
  0x4d   :  { %223 = vmatprep.subr.mxu0 %v279_v31 }
  0x4e   :  { %224 = vmatpush3.msra.mxu0 %v104_v11 }
  0x4f   :  { %225 = vmatprep.subr.mxu0 %v279_v31 }
  0x50   :  { %226 = vmatpush3.msra.mxu0 %v103_v13 }
  0x51   :  { %227 = vmatprep.subr.mxu0 %v279_v31 }
  0x52   :  { %228 = vmatpush3.msra.mxu0 %v102_v14 }
  0x53   :  { %229 = vmatprep.subr.mxu0 %v279_v31 }
  0x54   :  { %230 = vmatpush3.msra.mxu0 %v101_v16 }
  0x55   :  { %231 = vmatprep.subr.mxu0 %v279_v31 }
  0x56   :  { %232 = vmatpush3.msra.mxu0 %v100_v17 }
  0x57   :  { %233 = vmatprep.subr.mxu0 %v279_v31 }
  0x58   :  { %234 = vmatpush3.msra.mxu0 %v99_v19 }
  0x59   :  { %235 = vmatprep.subr.mxu0 %v279_v31 }
  0x5a   :  { %236 = vmatpush3.msra.mxu0 %v98_v20 }
  0x5b   :  { %237 = vmatprep.subr.mxu0 %v279_v31 }
  0x5c   :  { %238 = vmatpush3.msra.mxu0 %v97_v18 }
  0x5d   :  { %239 = vmatprep.subr.mxu0 %v279_v31 }
  0x5e   :  { %240 = vmatpush3.msra.mxu0 %v96_v15 }
  0x5f   :  { %241 = vmatprep.subr.mxu0 %v279_v31 }
  0x60   :  { %242 = vmatpush3.msra.mxu0 %v95_v12 }
  0x61   :  { %243 = vmatprep.subr.mxu0 %v279_v31 }
  0x62   :  { %244 = vmatpush3.msra.mxu0 %v94_v8 }
  0x8d   :  { %v18_v5 = vpop.xlane.xlu0 %17 }
  0x8e   :  { %253 = vrsqrt.f32 %v18_v5  ;;  %vm21_vm2 = vcmp.eq.f32.partialorder %v18_v5, inf  ;;  %v24_v22 = vand.u32 2147483648, %v18_v5  ;;  %vm23_vm3 = vcmp.eq.f32.partialorder %v18_v5, 0.0 }
  0x9b   :  { %v254_v21 = vpop.eup %253 }
  0x9c   :  { %v20_v4 = vmul.f32 %v254_v21, %v18_v5 }
  0x9e   :  { %v22_v23 = vsel %vm21_vm2, %v18_v5, %v20_v4 }
  0x9f   :  { %v25_v2 = vsel %vm23_vm3, %v24_v22, %v22_v23 }
  0xa0   :  { %v26_v24 = vadd.f32 1e-05, %v25_v2 }
  0xa2   :  { %255 = vrcp.f32 %v26_v24 }
  0xaf   :  { %v256_v25 = vpop.eup %255 }
  0xb0   :  { %v29_v1 = vmul.f32 %v256_v25, %v305_v0 }
  0xb2   :  { %246 = vmatmul.mubr.f32.vlgmr.msra.gmra.mxu0 %v29_v1 }
 0x172   :  { %v176_v26 = vpop.f32.mrf.mxu0 }
 0x173   :  { %v180_v27 = vmul.f32 2.0, %v176_v26 }
 0x174   :  { %v247_v28 = vpop.f32.mrf.mxu0 }
 0x175   :  { %181 = vst [vmem:[#allocation2] sm:$0xff] %v180_v27 }
 0x176   :  { %268 = shalt.err (!%p265_p4)
}
 0x177   :  { %191 = dma.vmem_to_hbm [thread:$0]  %s189_s19, 128, %s429_s3, [#allocation3]  }
 0x178   :  { %277 = dma.done.wait [#allocation3], 128  }
 0x179   :  { %278 = vsyncadd [#allocation3], 4294967168 }
 0x17a   :  { %195 = vsyncpa [#allocation3], 1 }

</bundles_post_ra>
